<compile_context>
chip_gen: v7x
topology: tpu7x:2x2x1
jax: 0.10.0
libtpu: 0.0.40
codegen_flags: <defaults>
</compile_context>

<pallas_src>
import functools
import math

import jax
import jax.numpy as jnp
from jax import lax
from jax.experimental import pallas as pl
from jax.experimental.pallas import tpu as pltpu


def _round_up(n, m):
    return ((n + m - 1) // m) * m


def _encoder_self_attn_kernel(x_ref, wq_ref, bq_ref, wk_ref, bk_ref,
                              wv_ref, bv_ref, wo_ref, bo_ref,
                              w1_ref, b1_ref, w2_ref, b2_ref,
                              out_ref, *, n_heads, d_head_pad):
    """One grid step == one batch element (grid axis is 'parallel')."""
    L = x_ref.shape[0]
    Dp = d_head_pad

    x = x_ref[...].astype(jnp.bfloat16)                      # (L, F)

    # Fused head projections: one wide bf16 MXU matmul each -> (L, H*Dp), f32 acc.
    # 1/sqrt(d_model) is already folded into wq/bq.
    q_all = (jnp.dot(x, wq_ref[...], preferred_element_type=jnp.float32)
             + bq_ref[...]).astype(jnp.bfloat16)
    k_all = (jnp.dot(x, wk_ref[...], preferred_element_type=jnp.float32)
             + bk_ref[...]).astype(jnp.bfloat16)
    v_all = (jnp.dot(x, wv_ref[...], preferred_element_type=jnp.float32)
             + bv_ref[...]).astype(jnp.bfloat16)

    # Per-head attention, accumulated straight into the output projection.
    # n_heads is small & static; the batch grid axis bounds live ranges, and all
    # head slices land on 128-lane boundaries (Dp is a multiple of 128).
    att = jnp.zeros((L, Dp), jnp.float32)
    for h in range(n_heads):
        c0 = h * Dp
        q = q_all[:, c0:c0 + Dp]                             # (L, Dp) bf16
        k = k_all[:, c0:c0 + Dp]
        v = v_all[:, c0:c0 + Dp]
        # Contract on K's last dim directly — no k.T / XLU transpose.
        scores = lax.dot_general(q, k, (((1,), (1,)), ((), ())),
                                 preferred_element_type=jnp.float32)  # (L, L)
        scores = scores - jnp.max(scores, axis=-1, keepdims=True)
        e = jnp.exp(scores)
        alphas = (e * pl.reciprocal(jnp.sum(e, axis=-1, keepdims=True),
                                    approx=True)).astype(jnp.bfloat16)
        ctx = jnp.dot(alphas, v,
                      preferred_element_type=jnp.float32).astype(jnp.bfloat16)
        # Accumulate into the output projection instead of concatenating heads.
        att = att + jnp.dot(ctx, wo_ref[h], preferred_element_type=jnp.float32)

    att = (att + bo_ref[...]).astype(jnp.bfloat16)           # (L, Dp)

    # FFN, fed directly from the value (no VMEM scratch round-trip).
    h1 = jnp.maximum(
        jnp.dot(att, w1_ref[...], preferred_element_type=jnp.float32)
        + b1_ref[...], 0.0).astype(jnp.bfloat16)             # (L, FFp)
    out_ref[...] = (jnp.dot(h1, w2_ref[...], preferred_element_type=jnp.float32)
                    + b2_ref[...])                           # (L, Dp) f32


def prepare_params(params, *, n_heads, d_model, d_head_pad, ff_pad):
    """One-time host-side layout prep: fuse heads, pad to 128 lanes, fold the
    1/sqrt(d_model) scale into Q, and cast matmul operands to bf16 (biases stay
    f32 since they add into the f32 accumulators)."""
    (wq, bq, wk, bk, wv, bv, wo, bo, w1, b1, w2, b2) = params
    F = wq.shape[1]
    ff = w1.shape[1]
    Dp, FFp = d_head_pad, ff_pad
    scale = 1.0 / math.sqrt(d_model)

    def fuse(w, b, s=1.0):
        # (H, F, D) -> (F, H, Dp) -> (F, H*Dp) bf16 ; (H, D) -> (1, H*Dp) f32.
        wp = jnp.pad(jnp.transpose(w, (1, 0, 2)) * s,
                     ((0, 0), (0, 0), (0, Dp - d_model)))
        bp = jnp.pad(b * s, ((0, 0), (0, Dp - d_model)))
        return (wp.reshape(F, n_heads * Dp).astype(jnp.bfloat16),
                bp.reshape(1, n_heads * Dp).astype(jnp.float32))

    wq_p, bq_p = fuse(wq, bq, scale)
    wk_p, bk_p = fuse(wk, bk)
    wv_p, bv_p = fuse(wv, bv)

    wo_p = jnp.pad(wo.reshape(n_heads, d_model, d_model),
                   ((0, 0), (0, Dp - d_model), (0, Dp - d_model))
                   ).astype(jnp.bfloat16)                     # (H, Dp, Dp)
    bo_p = jnp.pad(bo, ((0, 0), (0, Dp - d_model))).astype(jnp.float32)
    w1_p = jnp.pad(w1, ((0, Dp - d_model), (0, FFp - ff))).astype(jnp.bfloat16)
    b1_p = jnp.pad(b1, ((0, 0), (0, FFp - ff))).astype(jnp.float32)
    w2_p = jnp.pad(w2, ((0, FFp - ff), (0, Dp - d_model))).astype(jnp.bfloat16)
    b2_p = jnp.pad(b2, ((0, 0), (0, Dp - d_model))).astype(jnp.float32)
    return (wq_p, bq_p, wk_p, bk_p, wv_p, bv_p, wo_p, bo_p,
            w1_p, b1_p, w2_p, b2_p)


def _vmem_limit_bytes():
    """Per-generation VMEM limit (64 MiB on v7x, 128 MiB on v5e/v6e) with headroom."""
    try:
        cap = int(getattr(pltpu.get_tpu_info(), "vmem_capacity_bytes"))
    except Exception:
        cap = 64 * 1024 * 1024
    return max(32 * 1024 * 1024, min(int(cap * 0.75), 96 * 1024 * 1024))


def encoder_self_attn(x, prepared_params, *, n_heads, d_model, d_head_pad, ff_pad):
    """x: (B, L, F) f32 -> (B, L, d_model) f32. prepared_params from prepare_params()."""
    B, L, F = x.shape
    Dp, FFp = d_head_pad, ff_pad
    HDp = n_heads * Dp

    kernel = functools.partial(_encoder_self_attn_kernel,
                               n_heads=n_heads, d_head_pad=Dp)

    def resident(a):  # weight stays in VMEM across the whole grid, DMA'd once
        return pl.BlockSpec(a.shape, lambda b, _nd=a.ndim: (0,) * _nd)

    in_specs = ([pl.BlockSpec((None, L, F), lambda b: (b, 0, 0))]
                + [resident(w) for w in prepared_params])
    out_spec = pl.BlockSpec((None, L, Dp), lambda b: (b, 0, 0))

    flops = (2 * B * L * F * HDp * 3                   # fused Q/K/V projections
             + 2 * B * n_heads * L * L * Dp * 2        # scores + alphas @ V
             + 2 * B * n_heads * L * Dp * Dp           # output projection
             + 2 * B * L * Dp * FFp * 2)               # FFN
    bytes_accessed = (4 * B * L * F + 4 * B * L * Dp
                      + 2 * (3 * F * HDp + n_heads * Dp * Dp + 2 * Dp * FFp)
                      + 4 * (3 * HDp + FFp + 2 * Dp))
    cost = pl.CostEstimate(flops=flops, transcendentals=B * n_heads * L * L,
                           bytes_accessed=bytes_accessed)

    out_padded = pl.pallas_call(
        kernel,
        grid=(B,),
        out_shape=jax.ShapeDtypeStruct((B, L, Dp), jnp.float32),
        in_specs=in_specs,
        out_specs=out_spec,
        cost_estimate=cost,
        compiler_params=pltpu.CompilerParams(
            dimension_semantics=("parallel",),          # megacore shard on v7x
            vmem_limit_bytes=_vmem_limit_bytes()),
    )(x, *prepared_params)
    return out_padded[:, :, :d_model]


def _reference(x, params, *, n_heads, d_model):
    """Pure-JAX f32 reference mirroring the PyTorch forward (mask=None)."""
    (wq, bq, wk, bk, wv, bv, wo, bo, w1, b1, w2, b2) = params
    scale = 1.0 / jnp.sqrt(jnp.float32(d_model))
    ctxs = []
    for h in range(n_heads):
        q = x @ wq[h] + bq[h]
        k = x @ wk[h] + bk[h]
        v = x @ wv[h] + bv[h]
        s = jnp.einsum("blD,bkD->blk", q, k) * scale
        a = jax.nn.softmax(s, axis=-1)
        ctxs.append(jnp.einsum("blk,bkD->blD", a, v))
    att = jnp.concatenate(ctxs, axis=-1) @ wo + bo[0]
    return jnp.maximum(att @ w1 + b1[0], 0.0) @ w2 + b2[0]


def init_params(key, *, n_heads, d_model, ff_units, n_features):
    keys = jax.random.split(key, 12)
    s = 0.1
    wq = s * jax.random.normal(keys[0], (n_heads, n_features, d_model), jnp.float32)
    bq = s * jax.random.normal(keys[1], (n_heads, d_model), jnp.float32)
    wk = s * jax.random.normal(keys[2], (n_heads, n_features, d_model), jnp.float32)
    bk = s * jax.random.normal(keys[3], (n_heads, d_model), jnp.float32)
    wv = s * jax.random.normal(keys[4], (n_heads, n_features, d_model), jnp.float32)
    bv = s * jax.random.normal(keys[5], (n_heads, d_model), jnp.float32)
    wo = s * jax.random.normal(keys[6], (n_heads * d_model, d_model), jnp.float32)
    bo = s * jax.random.normal(keys[7], (1, d_model), jnp.float32)
    w1 = s * jax.random.normal(keys[8], (d_model, ff_units), jnp.float32)
    b1 = s * jax.random.normal(keys[9], (1, ff_units), jnp.float32)
    w2 = s * jax.random.normal(keys[10], (ff_units, d_model), jnp.float32)
    b2 = s * jax.random.normal(keys[11], (1, d_model), jnp.float32)
    return (wq, bq, wk, bk, wv, bv, wo, bo, w1, b1, w2, b2)


if __name__ == "__main__":
    # Small shapes consistent with the module's forward.
    n_heads, d_model, ff_units, n_features = 2, 16, 32, 8
    B, L = 2, 8
    Dp = _round_up(d_model, 128)      # lane-dense per-head / output width
    FFp = _round_up(ff_units, 128)    # lane-dense FFN hidden width

    key = jax.random.PRNGKey(0)
    k_x, k_p = jax.random.split(key)
    x = jax.random.normal(k_x, (B, L, n_features), jnp.float32)
    params = init_params(k_p, n_heads=n_heads, d_model=d_model,
                         ff_units=ff_units, n_features=n_features)
    prepared = prepare_params(params, n_heads=n_heads, d_model=d_model,
                              d_head_pad=Dp, ff_pad=FFp)   # one-time layout prep

    out = encoder_self_attn(x, prepared, n_heads=n_heads, d_model=d_model,
                            d_head_pad=Dp, ff_pad=FFp)
    out = jax.block_until_ready(out)

    ref = _reference(x, params, n_heads=n_heads, d_model=d_model)
    assert out.shape == (B, L, d_model)
    # Tolerance reflects bf16 MXU operands (f32 accumulation) plus the EUP
    # approximate reciprocal in the softmax denominator.
    assert jnp.allclose(out, ref, atol=2e-2, rtol=2e-2), "mismatch vs reference"

    print("KERNEL_OK")
</pallas_src>

<mosaic_0001>
module attributes {stable_mosaic.version = 11 : i64} {
  func.func @_encoder_self_attn_kernel(%arg0: i32, %arg1: memref<1x8x8xf32, #tpu.memory_space<vmem>>, %arg2: memref<8x256xbf16, #tpu.memory_space<vmem>>, %arg3: memref<1x256xf32, #tpu.memory_space<vmem>>, %arg4: memref<8x256xbf16, #tpu.memory_space<vmem>>, %arg5: memref<1x256xf32, #tpu.memory_space<vmem>>, %arg6: memref<8x256xbf16, #tpu.memory_space<vmem>>, %arg7: memref<1x256xf32, #tpu.memory_space<vmem>>, %arg8: memref<2x128x128xbf16, #tpu.memory_space<vmem>>, %arg9: memref<1x128xf32, #tpu.memory_space<vmem>>, %arg10: memref<128x128xbf16, #tpu.memory_space<vmem>>, %arg11: memref<1x128xf32, #tpu.memory_space<vmem>>, %arg12: memref<128x128xbf16, #tpu.memory_space<vmem>>, %arg13: memref<1x128xf32, #tpu.memory_space<vmem>>, %arg14: memref<1x8x128xf32, #tpu.memory_space<vmem>>) attributes {dimension_semantics = [#tpu.dimension_semantics<parallel>], iteration_bounds = array<i64: 2>, scalar_prefetch = 0 : i64, scratch_operands = 0 : i64, tpu.core_type = #tpu.core_type<tc>, window_params = [{transform_indices = @transform_0, window_bounds = array<i64: 1, 8, 8>}, {pipeline_mode = #tpu.pipeline_mode<synchronous>, transform_indices = @transform_1, window_bounds = array<i64: 8, 256>}, {pipeline_mode = #tpu.pipeline_mode<synchronous>, transform_indices = @transform_2, window_bounds = array<i64: 1, 256>}, {pipeline_mode = #tpu.pipeline_mode<synchronous>, transform_indices = @transform_3, window_bounds = array<i64: 8, 256>}, {pipeline_mode = #tpu.pipeline_mode<synchronous>, transform_indices = @transform_4, window_bounds = array<i64: 1, 256>}, {pipeline_mode = #tpu.pipeline_mode<synchronous>, transform_indices = @transform_5, window_bounds = array<i64: 8, 256>}, {pipeline_mode = #tpu.pipeline_mode<synchronous>, transform_indices = @transform_6, window_bounds = array<i64: 1, 256>}, {pipeline_mode = #tpu.pipeline_mode<synchronous>, transform_indices = @transform_7, window_bounds = array<i64: 2, 128, 128>}, {pipeline_mode = #tpu.pipeline_mode<synchronous>, transform_indices = @transform_8, window_bounds = array<i64: 1, 128>}, {pipeline_mode = #tpu.pipeline_mode<synchronous>, transform_indices = @transform_9, window_bounds = array<i64: 128, 128>}, {pipeline_mode = #tpu.pipeline_mode<synchronous>, transform_indices = @transform_10, window_bounds = array<i64: 1, 128>}, {pipeline_mode = #tpu.pipeline_mode<synchronous>, transform_indices = @transform_11, window_bounds = array<i64: 128, 128>}, {pipeline_mode = #tpu.pipeline_mode<synchronous>, transform_indices = @transform_12, window_bounds = array<i64: 1, 128>}, {transform_indices = @transform_13, window_bounds = array<i64: 1, 8, 128>}]} {
    %c0 = arith.constant 0 : index
    %c0_0 = arith.constant 0 : index
    %c0_1 = arith.constant 0 : index
    %0 = vector.load %arg1[%c0, %c0_0, %c0_1] : memref<1x8x8xf32, #tpu.memory_space<vmem>>, vector<1x8x8xf32>
    %1 = vector.shape_cast %0 : vector<1x8x8xf32> to vector<8x8xf32>
    %2 = arith.truncf %1 : vector<8x8xf32> to vector<8x8xbf16>
    %c0_2 = arith.constant 0 : index
    %c0_3 = arith.constant 0 : index
    %3 = vector.load %arg2[%c0_2, %c0_3] : memref<8x256xbf16, #tpu.memory_space<vmem>>, vector<8x256xbf16>
    %cst = arith.constant dense<0.000000e+00> : vector<8x256xf32>
    %4 = tpu.matmul %2, %3, %cst {dimension_numbers = #tpu.dot_dimension_numbers<[1], [0], [0], [1], [0, 0, 1, 1], [], []>} : vector<8x8xbf16>, vector<8x256xbf16>, vector<8x256xf32> -> vector<8x256xf32>
    %c0_4 = arith.constant 0 : index
    %c0_5 = arith.constant 0 : index
    %5 = vector.load %arg3[%c0_4, %c0_5] : memref<1x256xf32, #tpu.memory_space<vmem>>, vector<1x256xf32>
    %6 = vector.broadcast %5 : vector<1x256xf32> to vector<8x256xf32>
    %7 = arith.addf %4, %6 : vector<8x256xf32>
    %8 = arith.truncf %7 : vector<8x256xf32> to vector<8x256xbf16>
    %c0_6 = arith.constant 0 : index
    %c0_7 = arith.constant 0 : index
    %9 = vector.load %arg4[%c0_6, %c0_7] : memref<8x256xbf16, #tpu.memory_space<vmem>>, vector<8x256xbf16>
    %cst_8 = arith.constant dense<0.000000e+00> : vector<8x256xf32>
    %10 = tpu.matmul %2, %9, %cst_8 {dimension_numbers = #tpu.dot_dimension_numbers<[1], [0], [0], [1], [0, 0, 1, 1], [], []>} : vector<8x8xbf16>, vector<8x256xbf16>, vector<8x256xf32> -> vector<8x256xf32>
    %c0_9 = arith.constant 0 : index
    %c0_10 = arith.constant 0 : index
    %11 = vector.load %arg5[%c0_9, %c0_10] : memref<1x256xf32, #tpu.memory_space<vmem>>, vector<1x256xf32>
    %12 = vector.broadcast %11 : vector<1x256xf32> to vector<8x256xf32>
    %13 = arith.addf %10, %12 : vector<8x256xf32>
    %14 = arith.truncf %13 : vector<8x256xf32> to vector<8x256xbf16>
    %c0_11 = arith.constant 0 : index
    %c0_12 = arith.constant 0 : index
    %15 = vector.load %arg6[%c0_11, %c0_12] : memref<8x256xbf16, #tpu.memory_space<vmem>>, vector<8x256xbf16>
    %cst_13 = arith.constant dense<0.000000e+00> : vector<8x256xf32>
    %16 = tpu.matmul %2, %15, %cst_13 {dimension_numbers = #tpu.dot_dimension_numbers<[1], [0], [0], [1], [0, 0, 1, 1], [], []>} : vector<8x8xbf16>, vector<8x256xbf16>, vector<8x256xf32> -> vector<8x256xf32>
    %c0_14 = arith.constant 0 : index
    %c0_15 = arith.constant 0 : index
    %17 = vector.load %arg7[%c0_14, %c0_15] : memref<1x256xf32, #tpu.memory_space<vmem>>, vector<1x256xf32>
    %18 = vector.broadcast %17 : vector<1x256xf32> to vector<8x256xf32>
    %19 = arith.addf %16, %18 : vector<8x256xf32>
    %20 = arith.truncf %19 : vector<8x256xf32> to vector<8x256xbf16>
    %cst_16 = arith.constant 0.000000e+00 : f32
    %21 = vector.broadcast %cst_16 : f32 to vector<8x128xf32>
    %22 = vector.extract_strided_slice %8 {offsets = [0, 0], sizes = [8, 128], strides = [1, 1]} : vector<8x256xbf16> to vector<8x128xbf16>
    %23 = vector.extract_strided_slice %14 {offsets = [0, 0], sizes = [8, 128], strides = [1, 1]} : vector<8x256xbf16> to vector<8x128xbf16>
    %24 = vector.extract_strided_slice %20 {offsets = [0, 0], sizes = [8, 128], strides = [1, 1]} : vector<8x256xbf16> to vector<8x128xbf16>
    %cst_17 = arith.constant dense<0.000000e+00> : vector<8x8xf32>
    %25 = tpu.matmul %22, %23, %cst_17 {dimension_numbers = #tpu.dot_dimension_numbers<[1], [1], [0], [0], [0, 0, 1, 0], [], []>} : vector<8x128xbf16>, vector<8x128xbf16>, vector<8x8xf32> -> vector<8x8xf32>
    %cst_18 = arith.constant dense<0xFF800000> : vector<8xf32>
    %26 = vector.multi_reduction <maximumf>, %25, %cst_18 [1] : vector<8x8xf32> to vector<8xf32>
    %27 = vector.shape_cast %26 : vector<8xf32> to vector<8x1xf32>
    %28 = vector.broadcast %27 : vector<8x1xf32> to vector<8x8xf32>
    %29 = arith.subf %25, %28 : vector<8x8xf32>
    %30 = math.exp %29 : vector<8x8xf32>
    %cst_19 = arith.constant dense<0.000000e+00> : vector<8xf32>
    %31 = vector.multi_reduction <add>, %30, %cst_19 [1] : vector<8x8xf32> to vector<8xf32>
    %32 = vector.shape_cast %31 : vector<8xf32> to vector<8x1xf32>
    %33 = tpu.reciprocal %32 {approx = true} : vector<8x1xf32> -> vector<8x1xf32>
    %34 = vector.broadcast %33 : vector<8x1xf32> to vector<8x8xf32>
    %35 = arith.mulf %30, %34 : vector<8x8xf32>
    %36 = arith.truncf %35 : vector<8x8xf32> to vector<8x8xbf16>
    %cst_20 = arith.constant dense<0.000000e+00> : vector<8x128xf32>
    %37 = tpu.matmul %36, %24, %cst_20 {dimension_numbers = #tpu.dot_dimension_numbers<[1], [0], [0], [1], [0, 0, 1, 1], [], []>} : vector<8x8xbf16>, vector<8x128xbf16>, vector<8x128xf32> -> vector<8x128xf32>
    %38 = arith.truncf %37 : vector<8x128xf32> to vector<8x128xbf16>
    %c0_21 = arith.constant 0 : index
    %c0_22 = arith.constant 0 : index
    %c0_23 = arith.constant 0 : index
    %39 = vector.load %arg8[%c0_21, %c0_22, %c0_23] : memref<2x128x128xbf16, #tpu.memory_space<vmem>>, vector<1x128x128xbf16>
    %40 = vector.shape_cast %39 : vector<1x128x128xbf16> to vector<128x128xbf16>
    %cst_24 = arith.constant dense<0.000000e+00> : vector<8x128xf32>
    %41 = tpu.matmul %38, %40, %cst_24 {dimension_numbers = #tpu.dot_dimension_numbers<[1], [0], [0], [1], [0, 0, 1, 1], [], []>} : vector<8x128xbf16>, vector<128x128xbf16>, vector<8x128xf32> -> vector<8x128xf32>
    %42 = arith.addf %21, %41 : vector<8x128xf32>
    %43 = vector.extract_strided_slice %8 {offsets = [0, 128], sizes = [8, 128], strides = [1, 1]} : vector<8x256xbf16> to vector<8x128xbf16>
    %44 = vector.extract_strided_slice %14 {offsets = [0, 128], sizes = [8, 128], strides = [1, 1]} : vector<8x256xbf16> to vector<8x128xbf16>
    %45 = vector.extract_strided_slice %20 {offsets = [0, 128], sizes = [8, 128], strides = [1, 1]} : vector<8x256xbf16> to vector<8x128xbf16>
    %cst_25 = arith.constant dense<0.000000e+00> : vector<8x8xf32>
    %46 = tpu.matmul %43, %44, %cst_25 {dimension_numbers = #tpu.dot_dimension_numbers<[1], [1], [0], [0], [0, 0, 1, 0], [], []>} : vector<8x128xbf16>, vector<8x128xbf16>, vector<8x8xf32> -> vector<8x8xf32>
    %cst_26 = arith.constant dense<0xFF800000> : vector<8xf32>
    %47 = vector.multi_reduction <maximumf>, %46, %cst_26 [1] : vector<8x8xf32> to vector<8xf32>
    %48 = vector.shape_cast %47 : vector<8xf32> to vector<8x1xf32>
    %49 = vector.broadcast %48 : vector<8x1xf32> to vector<8x8xf32>
    %50 = arith.subf %46, %49 : vector<8x8xf32>
    %51 = math.exp %50 : vector<8x8xf32>
    %cst_27 = arith.constant dense<0.000000e+00> : vector<8xf32>
    %52 = vector.multi_reduction <add>, %51, %cst_27 [1] : vector<8x8xf32> to vector<8xf32>
    %53 = vector.shape_cast %52 : vector<8xf32> to vector<8x1xf32>
    %54 = tpu.reciprocal %53 {approx = true} : vector<8x1xf32> -> vector<8x1xf32>
    %55 = vector.broadcast %54 : vector<8x1xf32> to vector<8x8xf32>
    %56 = arith.mulf %51, %55 : vector<8x8xf32>
    %57 = arith.truncf %56 : vector<8x8xf32> to vector<8x8xbf16>
    %cst_28 = arith.constant dense<0.000000e+00> : vector<8x128xf32>
    %58 = tpu.matmul %57, %45, %cst_28 {dimension_numbers = #tpu.dot_dimension_numbers<[1], [0], [0], [1], [0, 0, 1, 1], [], []>} : vector<8x8xbf16>, vector<8x128xbf16>, vector<8x128xf32> -> vector<8x128xf32>
    %59 = arith.truncf %58 : vector<8x128xf32> to vector<8x128xbf16>
    %c1 = arith.constant 1 : index
    %c0_29 = arith.constant 0 : index
    %c0_30 = arith.constant 0 : index
    %60 = vector.load %arg8[%c1, %c0_29, %c0_30] : memref<2x128x128xbf16, #tpu.memory_space<vmem>>, vector<1x128x128xbf16>
    %61 = vector.shape_cast %60 : vector<1x128x128xbf16> to vector<128x128xbf16>
    %cst_31 = arith.constant dense<0.000000e+00> : vector<8x128xf32>
    %62 = tpu.matmul %59, %61, %cst_31 {dimension_numbers = #tpu.dot_dimension_numbers<[1], [0], [0], [1], [0, 0, 1, 1], [], []>} : vector<8x128xbf16>, vector<128x128xbf16>, vector<8x128xf32> -> vector<8x128xf32>
    %63 = arith.addf %42, %62 : vector<8x128xf32>
    %c0_32 = arith.constant 0 : index
    %c0_33 = arith.constant 0 : index
    %64 = vector.load %arg9[%c0_32, %c0_33] : memref<1x128xf32, #tpu.memory_space<vmem>>, vector<1x128xf32>
    %65 = vector.broadcast %64 : vector<1x128xf32> to vector<8x128xf32>
    %66 = arith.addf %63, %65 : vector<8x128xf32>
    %67 = arith.truncf %66 : vector<8x128xf32> to vector<8x128xbf16>
    %c0_34 = arith.constant 0 : index
    %c0_35 = arith.constant 0 : index
    %68 = vector.load %arg10[%c0_34, %c0_35] : memref<128x128xbf16, #tpu.memory_space<vmem>>, vector<128x128xbf16>
    %cst_36 = arith.constant dense<0.000000e+00> : vector<8x128xf32>
    %69 = tpu.matmul %67, %68, %cst_36 {dimension_numbers = #tpu.dot_dimension_numbers<[1], [0], [0], [1], [0, 0, 1, 1], [], []>} : vector<8x128xbf16>, vector<128x128xbf16>, vector<8x128xf32> -> vector<8x128xf32>
    %c0_37 = arith.constant 0 : index
    %c0_38 = arith.constant 0 : index
    %70 = vector.load %arg11[%c0_37, %c0_38] : memref<1x128xf32, #tpu.memory_space<vmem>>, vector<1x128xf32>
    %71 = vector.broadcast %70 : vector<1x128xf32> to vector<8x128xf32>
    %72 = arith.addf %69, %71 : vector<8x128xf32>
    %cst_39 = arith.constant 0.000000e+00 : f32
    %73 = vector.broadcast %cst_39 : f32 to vector<8x128xf32>
    %74 = arith.maximumf %72, %73 : vector<8x128xf32>
    %75 = arith.truncf %74 : vector<8x128xf32> to vector<8x128xbf16>
    %c0_40 = arith.constant 0 : index
    %c0_41 = arith.constant 0 : index
    %76 = vector.load %arg12[%c0_40, %c0_41] : memref<128x128xbf16, #tpu.memory_space<vmem>>, vector<128x128xbf16>
    %cst_42 = arith.constant dense<0.000000e+00> : vector<8x128xf32>
    %77 = tpu.matmul %75, %76, %cst_42 {dimension_numbers = #tpu.dot_dimension_numbers<[1], [0], [0], [1], [0, 0, 1, 1], [], []>} : vector<8x128xbf16>, vector<128x128xbf16>, vector<8x128xf32> -> vector<8x128xf32>
    %c0_43 = arith.constant 0 : index
    %c0_44 = arith.constant 0 : index
    %78 = vector.load %arg13[%c0_43, %c0_44] : memref<1x128xf32, #tpu.memory_space<vmem>>, vector<1x128xf32>
    %79 = vector.broadcast %78 : vector<1x128xf32> to vector<8x128xf32>
    %80 = arith.addf %77, %79 : vector<8x128xf32>
    %c0_45 = arith.constant 0 : index
    %c0_46 = arith.constant 0 : index
    %c0_47 = arith.constant 0 : index
    %81 = vector.load %arg14[%c0_45, %c0_46, %c0_47] : memref<1x8x128xf32, #tpu.memory_space<vmem>>, vector<1x8x128xf32>
    %82 = vector.shape_cast %81 : vector<1x8x128xf32> to vector<8x128xf32>
    %83 = vector.shape_cast %80 : vector<8x128xf32> to vector<1x8x128xf32>
    tpu.vector_store %arg14[%c0_45, %c0_46, %c0_47], %83 {strides = array<i32>} : memref<1x8x128xf32, #tpu.memory_space<vmem>>, vector<1x8x128xf32>,
    return
  }
  func.func @transform_0(%arg0: i32) -> (i32, i32, i32) {
    %c0_i32 = arith.constant 0 : i32
    %c0_i32_0 = arith.constant 0 : i32
    %c0_i32_1 = arith.constant 0 : i32
    return %arg0, %c0_i32, %c0_i32_0 : i32, i32, i32
  }
  func.func @transform_1(%arg0: i32) -> (i32, i32) {
    %c0_i32 = arith.constant 0 : i32
    %c0_i32_0 = arith.constant 0 : i32
    %c0_i32_1 = arith.constant 0 : i32
    return %c0_i32, %c0_i32_0 : i32, i32
  }
  func.func @transform_2(%arg0: i32) -> (i32, i32) {
    %c0_i32 = arith.constant 0 : i32
    %c0_i32_0 = arith.constant 0 : i32
    %c0_i32_1 = arith.constant 0 : i32
    return %c0_i32, %c0_i32_0 : i32, i32
  }
  func.func @transform_3(%arg0: i32) -> (i32, i32) {
    %c0_i32 = arith.constant 0 : i32
    %c0_i32_0 = arith.constant 0 : i32
    %c0_i32_1 = arith.constant 0 : i32
    return %c0_i32, %c0_i32_0 : i32, i32
  }
  func.func @transform_4(%arg0: i32) -> (i32, i32) {
    %c0_i32 = arith.constant 0 : i32
    %c0_i32_0 = arith.constant 0 : i32
    %c0_i32_1 = arith.constant 0 : i32
    return %c0_i32, %c0_i32_0 : i32, i32
  }
  func.func @transform_5(%arg0: i32) -> (i32, i32) {
    %c0_i32 = arith.constant 0 : i32
    %c0_i32_0 = arith.constant 0 : i32
    %c0_i32_1 = arith.constant 0 : i32
    return %c0_i32, %c0_i32_0 : i32, i32
  }
  func.func @transform_6(%arg0: i32) -> (i32, i32) {
    %c0_i32 = arith.constant 0 : i32
    %c0_i32_0 = arith.constant 0 : i32
    %c0_i32_1 = arith.constant 0 : i32
    return %c0_i32, %c0_i32_0 : i32, i32
  }
  func.func @transform_7(%arg0: i32) -> (i32, i32, i32) {
    %c0_i32 = arith.constant 0 : i32
    %c0_i32_0 = arith.constant 0 : i32
    %c0_i32_1 = arith.constant 0 : i32
    %c0_i32_2 = arith.constant 0 : i32
    return %c0_i32, %c0_i32_0, %c0_i32_1 : i32, i32, i32
  }
  func.func @transform_8(%arg0: i32) -> (i32, i32) {
    %c0_i32 = arith.constant 0 : i32
    %c0_i32_0 = arith.constant 0 : i32
    %c0_i32_1 = arith.constant 0 : i32
    return %c0_i32, %c0_i32_0 : i32, i32
  }
  func.func @transform_9(%arg0: i32) -> (i32, i32) {
    %c0_i32 = arith.constant 0 : i32
    %c0_i32_0 = arith.constant 0 : i32
    %c0_i32_1 = arith.constant 0 : i32
    return %c0_i32, %c0_i32_0 : i32, i32
  }
  func.func @transform_10(%arg0: i32) -> (i32, i32) {
    %c0_i32 = arith.constant 0 : i32
    %c0_i32_0 = arith.constant 0 : i32
    %c0_i32_1 = arith.constant 0 : i32
    return %c0_i32, %c0_i32_0 : i32, i32
  }
  func.func @transform_11(%arg0: i32) -> (i32, i32) {
    %c0_i32 = arith.constant 0 : i32
    %c0_i32_0 = arith.constant 0 : i32
    %c0_i32_1 = arith.constant 0 : i32
    return %c0_i32, %c0_i32_0 : i32, i32
  }
  func.func @transform_12(%arg0: i32) -> (i32, i32) {
    %c0_i32 = arith.constant 0 : i32
    %c0_i32_0 = arith.constant 0 : i32
    %c0_i32_1 = arith.constant 0 : i32
    return %c0_i32, %c0_i32_0 : i32, i32
  }
  func.func @transform_13(%arg0: i32) -> (i32, i32, i32) {
    %c0_i32 = arith.constant 0 : i32
    %c0_i32_0 = arith.constant 0 : i32
    %c0_i32_1 = arith.constant 0 : i32
    return %arg0, %c0_i32, %c0_i32_0 : i32, i32, i32
  }
}

</mosaic_0001>

<bundles_post_ra>
// kernel: tpu_custom_call.1
= control target key start
LH: loop header
LB: loop body
LE: loop exit
PB: predicated region body
PF: predicated region fallthrough
CT: control target
= control target key end

     0   :  { %s2603_s0 = inlined_call_operand.hbm [shape: f32[2,8,8], index: 0, kind: input, shape index: {}]   ;;  %s2604_s1 = inlined_call_operand.hbm [shape: bf16[8,256], index: 1, kind: input, shape index: {}]   ;;  %s2605_s2 = inlined_call_operand.vmem [shape: f32[1,256], index: 2, kind: input, shape index: {}]   ;;  %s2606_s3 = inlined_call_operand.vmem [shape: bf16[8,256], index: 3, kind: input, shape index: {}]   ;;  %s2607_s4 = inlined_call_operand.hbm [shape: f32[1,256], index: 4, kind: input, shape index: {}]   ;;  %s2608_s5 = inlined_call_operand.vmem [shape: bf16[8,256], index: 5, kind: input, shape index: {}]   ;;  %s2609_s6 = inlined_call_operand.vmem [shape: f32[1,256], index: 6, kind: input, shape index: {}]   ;;  %s2610_s7 = inlined_call_operand.hbm [shape: bf16[2,128,128], index: 7, kind: input, shape index: {}]   ;;  %s2611_s8 = inlined_call_operand.vmem [shape: f32[1,128], index: 8, kind: input, shape index: {}]   ;;  %s2612_s9 = inlined_call_operand.hbm [shape: bf16[128,128], index: 9, kind: input, shape index: {}]   ;;  %s2613_s10 = inlined_call_operand.vmem [shape: f32[1,128], index: 10, kind: input, shape index: {}]   ;;  %s2614_s11 = inlined_call_operand.hbm [shape: bf16[128,128], index: 11, kind: input, shape index: {}]   ;;  %s2615_s12 = inlined_call_operand.vmem [shape: f32[1,128], index: 12, kind: input, shape index: {}]   ;;  %s2616_s13 = inlined_call_operand.hbm [shape: f32[2,8,128], index: 13, kind: output, shape index: {}]  }
   0x1   :  { %2625 = sst [smem:[#allocation19_spill]] %s2604_s1 }
   0x2   :  { %2626 = sst [smem:[#allocation20_spill]] %s2607_s4 }
   0x3   :  { %2627 = sst [smem:[#allocation21_spill]] %s2613_s10 }
   0x4   :  { %2628 = sst [smem:[#allocation22_spill]] %s2615_s12 }
   0x5   :  { %2629 = sst [smem:[#allocation23_spill]] %s2616_s13 }
   0x6   :  { %18 = vsyncpa [#allocation3], 0 }
   0x7   :  { %20 = vsyncpa [#allocation3 + $0x1], 0 }
   0x8   :  { %21 = vsyncpa [#allocation6], 0 }
   0x9   :  { %22 = vsyncpa [#allocation9], 0 }
   0xa   :  { %23 = vsyncpa [#allocation12], 0 }
   0xb   :  { %24 = vsyncpa [#allocation4], 0 }
   0xc   :  { %26 = vsyncpa [#allocation4 + $0x1], 0  ;;  %s2206_s25 = smov 0   ;;  %s2208_s26 = smov 0  }
   0xd   :  { %s2210_s27 = smov 0   ;;  %s2212_s28 = smov 0  }
   0xe LB: > { %s2124_s29 = smov [#allocation5]   ;;  %s2227_s14 = sadd.s32 4294967295, %s2122_s28   ;;  %s2122_s28 = sphi %s2212_s28, %s2658_s28   ;;  %s2118_s27 = sphi %s2210_s27, %s2657_s27   ;;  %s2114_s26 = sphi %s2208_s26, %s2656_s26   ;;  %s2110_s25 = sphi %s2206_s25, %s2655_s25  }
   0xf   : > { %s354_s30 = sshll.u32 %s2124_s29, 4  ;;  %p1508_p0 = scmp.ge.s32.totalorder %s2122_s28, 1  ;;  %s355_s30 = int_to_ptr.vmem [resolvable:$true] %s354_s30 }
  0x10   : > { %p2618_p1 = scmp.eq.s32.totalorder %s2227_s14, 0  ;;  %p341_p2 = scmp.lt.s32.totalorder %s2122_s28, 3 }
  0x11   : > { %s2125_s16 = smov [#allocation8]   ;;  %s2126_s19 = smov [#allocation7]  }
  0x12   : > { %p2232_p3 = pnand %p1508_p0, %p341_p2  ;;  %s387_s17 = sshll.u32 %s2125_s16, 4  ;;  %s2239_s17 = int_to_ptr.vmem [resolvable:$true] %s387_s17 }
  0x13   : > { %s371_s20 = sshll.u32 %s2126_s19, 4  ;;  %s2632_s1 = sld [smem:[#allocation19_spill]]  ;;  %s2247_s20 = int_to_ptr.vmem [resolvable:$true] %s371_s20 }
  0x14   : > { %s2630_s15 = scalar_select %p2232_p3, 1, 0 }
  0x15   : > { %p1750_p5 = pneg %p2232_p3 }
  0x17   : > { %p2243_p6 = pnand %p1750_p5, %p2618_p1 }
  0x19   : > { %s1874_s23 = scalar_lea.hbm %s2632_s1, 128  ;;  %p2257_p8 = pneg %p2243_p6 }
  0x1a   : > { %p1875_p7 = scmp.ne.s32.totalorder %s2632_s1, %s1874_s23  ;;  %p1881_p11 = scmp.lt.u32.totalorder %s1874_s23, %s2632_s1 }
  0x1c   : > { %p1877_p9 = pnand %p2257_p8, %p1875_p7 }
  0x1e   : > { %p1878_p10 = pneg %p1877_p9 }
  0x20   : > { %p1883_p12 = pnand %p1881_p11, %p1878_p10 }
  0x22   : > { %1886 = shalt.err (!%p1883_p12)
}
  0x23   : > { %s1887_s21 = scalar_lea.vmem %s355_s30, 128  ;;  %p1895_p5 = scmp.lt.s32.totalorder %s355_s30, %s355_s30 }
  0x24   : > { %p1888_p13 = scmp.ne.s32.totalorder %s355_s30, %s1887_s21  ;;  %p1896_p4 = scmp.lt.s32.totalorder %s1887_s21, %s1887_s21 }
  0x26   : > { %p1890_p0 = pnand %p1888_p13, %p2257_p8  ;;  %p1897_p1 = por %p1896_p4, %p1895_p5 }
  0x28   : > { %p1891_p2 = pneg %p1890_p0 }
  0x2a   : > { %p1898_p3 = pnand %p1897_p1, %p1891_p2 }
  0x2c   : > { %1901 = shalt.err (!%p1898_p3)
}
  0x2d   : > { %1753 = dma.hbm_to_vmem [thread:$0]  (!%p2243_p6), %s2632_s1, 128, %s355_s30, [#allocation6]  }
  0x2e   : > { %s1902_s29 = scalar_lea.hbm %s2610_s7, 2048 }
  0x2f   : > { %p1903_p7 = scmp.ne.s32.totalorder %s2610_s7, %s1902_s29  ;;  %p1909_p1 = scmp.lt.u32.totalorder %s1902_s29, %s2610_s7 }
  0x31   : > { %p1905_p9 = pnand %p1903_p7, %p2257_p8 }
  0x33   : > { %p1906_p4 = pneg %p1905_p9 }
  0x35   : > { %p1911_p3 = pnand %p1909_p1, %p1906_p4 }
  0x37   : > { %1914 = shalt.err (!%p1911_p3)
}
  0x38   : > { %s1915_s30 = scalar_lea.vmem %s2239_s17, 2048  ;;  %p1923_p13 = scmp.lt.s32.totalorder %s2239_s17, %s2239_s17 }
  0x39   : > { %p1916_p10 = scmp.ne.s32.totalorder %s2239_s17, %s1915_s30  ;;  %p1924_p0 = scmp.lt.s32.totalorder %s1915_s30, %s1915_s30 }
  0x3b   : > { %p1918_p11 = pnand %p1916_p10, %p2257_p8  ;;  %p1925_p2 = por %p1924_p0, %p1923_p13 }
  0x3d   : > { %p1919_p12 = pneg %p1918_p11 }
  0x3f   : > { %p1926_p5 = pnand %p1925_p2, %p1919_p12 }
  0x41   : > { %1929 = shalt.err (!%p1926_p5)
}
  0x42   : > { %s2620_s12 = smov 64   ;;  %s2622_s10 = smov 4  }
  0x43   : > { %1759 = dma.hbm_to_vmem [thread:$0]  (!%p2243_p6), %s2610_s7, 2048, %s2239_s17, [#allocation9], %s2620_s12, %s2620_s12, %s2622_s10  }
  0x44   : > { %s2634_s4 = sld [smem:[#allocation20_spill]] }
  0x4a   : > { %s1930_s29 = scalar_lea.hbm %s2634_s4, 32 }
  0x4b   : > { %p1931_p7 = scmp.ne.s32.totalorder %s2634_s4, %s1930_s29  ;;  %p1937_p1 = scmp.lt.u32.totalorder %s1930_s29, %s2634_s4 }
  0x4d   : > { %p1933_p9 = pnand %p1931_p7, %p2257_p8 }
  0x4f   : > { %p1934_p4 = pneg %p1933_p9 }
  0x51   : > { %p1939_p3 = pnand %p1937_p1, %p1934_p4 }
  0x53   : > { %1942 = shalt.err (!%p1939_p3)
}
  0x54   : > { %s1943_s17 = scalar_lea.vmem %s2247_s20, 32  ;;  %p1951_p13 = scmp.lt.s32.totalorder %s2247_s20, %s2247_s20 }
  0x55   : > { %p1944_p10 = scmp.ne.s32.totalorder %s2247_s20, %s1943_s17  ;;  %p1952_p0 = scmp.lt.s32.totalorder %s1943_s17, %s1943_s17 }
  0x57   : > { %p1946_p11 = pnand %p1944_p10, %p2257_p8  ;;  %p1953_p2 = por %p1952_p0, %p1951_p13 }
  0x59   : > { %p1947_p12 = pneg %p1946_p11 }
  0x5b   : > { %p1954_p5 = pnand %p1953_p2, %p1947_p12 }
  0x5d   : > { %1957 = shalt.err (!%p1954_p5)
}
  0x5e   : > { %1756 = dma.hbm_to_vmem [thread:$0]  (!%p2243_p6), %s2634_s4, 32, %s2247_s20, [#allocation6]  }
  0x5f   : > { %s2129_s24 = smov [#allocation10]   ;;  %s2130_s23 = smov [#allocation11]  }
  0x60   : > { %s403_s13 = sshll.u32 %s2129_s24, 4  ;;  %s419_s29 = sshll.u32 %s2130_s23, 4  ;;  %s404_s13 = int_to_ptr.vmem [resolvable:$true] %s403_s13  ;;  %s420_s29 = int_to_ptr.vmem [resolvable:$true] %s419_s29 }
  0x61   : > { %s1958_s30 = scalar_lea.hbm %s2612_s9, 1024 }
  0x62   : > { %p1959_p7 = scmp.ne.s32.totalorder %s2612_s9, %s1958_s30  ;;  %p1965_p1 = scmp.lt.u32.totalorder %s1958_s30, %s2612_s9 }
  0x64   : > { %p1961_p9 = pnand %p1959_p7, %p2257_p8 }
  0x66   : > { %p1962_p4 = pneg %p1961_p9 }
  0x68   : > { %p1967_p3 = pnand %p1965_p1, %p1962_p4 }
  0x6a   : > { %1970 = shalt.err (!%p1967_p3)
}
  0x6b   : > { %s1971_s20 = scalar_lea.vmem %s404_s13, 1024  ;;  %p1979_p13 = scmp.lt.s32.totalorder %s404_s13, %s404_s13 }
  0x6c   : > { %p1972_p10 = scmp.ne.s32.totalorder %s404_s13, %s1971_s20  ;;  %p1980_p0 = scmp.lt.s32.totalorder %s1971_s20, %s1971_s20 }
  0x6e   : > { %p1974_p11 = pnand %p1972_p10, %p2257_p8  ;;  %p1981_p2 = por %p1980_p0, %p1979_p13 }
  0x70   : > { %p1975_p12 = pneg %p1974_p11 }
  0x72   : > { %p1982_p5 = pnand %p1981_p2, %p1975_p12 }
  0x74   : > { %1985 = shalt.err (!%p1982_p5)
}
  0x75   : > { %s2635_s12 = smov 4   ;;  %s2636_s22 = smov 64  }
  0x76   : > { %1762 = dma.hbm_to_vmem [thread:$0]  (!%p2243_p6), %s2612_s9, 1024, %s404_s13, [#allocation9], %s2636_s22, %s2636_s22, %s2635_s12  }
  0x77   : > { %s1986_s21 = scalar_lea.hbm %s2614_s11, 1024 }
  0x78   : > { %p1987_p7 = scmp.ne.s32.totalorder %s2614_s11, %s1986_s21  ;;  %p1993_p1 = scmp.lt.u32.totalorder %s1986_s21, %s2614_s11 }
  0x7a   : > { %p1989_p9 = pnand %p1987_p7, %p2257_p8 }
  0x7c   : > { %p1990_p4 = pneg %p1989_p9 }
  0x7e   : > { %p1995_p3 = pnand %p1993_p1, %p1990_p4 }
  0x80   : > { %1998 = shalt.err (!%p1995_p3)
}
  0x81   : > { %s1999_s10 = scalar_lea.vmem %s420_s29, 1024  ;;  %p2007_p13 = scmp.lt.s32.totalorder %s420_s29, %s420_s29 }
  0x82   : > { %p2000_p10 = scmp.ne.s32.totalorder %s420_s29, %s1999_s10  ;;  %p2008_p0 = scmp.lt.s32.totalorder %s1999_s10, %s1999_s10 }
  0x84   : > { %p2002_p11 = pnand %p2000_p10, %p2257_p8  ;;  %p2009_p2 = por %p2008_p0, %p2007_p13 }
  0x86   : > { %p2003_p12 = pneg %p2002_p11 }
  0x88   : > { %p2010_p5 = pnand %p2009_p2, %p2003_p12 }
  0x8a   : > { %2013 = shalt.err (!%p2010_p5)
}
  0x8b   : > { %1765 = dma.hbm_to_vmem [thread:$0]  (!%p2243_p6), %s2614_s11, 1024, %s420_s29, [#allocation12], %s2636_s22, %s2636_s22, %s2635_s12  }
  0x8c   : > { %s1507_s18 = sadd.s32 4294967294, %s2122_s28   ;;  %s2366_s16 = sadd.s32 1, %s2122_s28  }
  0x8d   : > { %s39_s23 = sadd.s32 1, %s2118_s27  ;;  %s36_s19 = ssub.s32 %s2122_s28, %s2366_s16 }
  0x8e   : > { %p46_p8 = scmp.ne.s32.totalorder %s2118_s27, %s2114_s26  ;;  %p37_p7 = scmp.eq.s32.totalorder %s36_s19, 0 }
  0x8f   : > { %p47_p9 = scmp.eq.s32.totalorder %s2122_s28, 0  ;;  %p52_p4 = scmp.ne.s32.totalorder %s2114_s26, %s2110_s25 }
  0x90   : > { %p328_p1 = scmp.eq.s32.totalorder %s2227_s14, 1  ;;  %p2637_p10 = scmp.eq.s32.totalorder %s2227_s14, 0 }
  0x91   : > { %s2378_s21 = scalar_select %p37_p7, %s2118_s27, %s39_s23  }
  0x92   : > { %p48_p3 = por %p47_p9, %p46_p8  ;;  %p2382_p11 = por %p2637_p10, %p52_p4 }
  0x93   : > { %p2386_p6 = por %p328_p1, %p46_p8  ;;  %p334_p12 = scmp.eq.s32.totalorder %s1507_s18, 1 }
  0x94   : > { %p1779_p13 = scmp.lt.s32.totalorder %s2122_s28, 2  ;;  %s436_s12 = sand.u32 1, %s2118_s27  }
  0x95   : > { %s2639_s29 = scalar_select %p2386_p6, 1, 0 }
  0x96   : > { %p2392_p0 = por %p334_p12, %p52_p4  ;;  %s1515_s17 = sshll.u32 %s436_s12, 3 }
  0x97   : > { %s1516_s1 = sshll.u32 %s2122_s28, 7  ;;  %s440_s24 = scalar_lea.vmem [#allocation2], %s1515_s17 }
  0x98   : > { %s2640_s22 = scalar_select %p2392_p0, 1, 0 }
  0x99   : > { %s2400_s13 = scalar_lea.hbm %s2603_s0, %s1516_s1  ;;  %s447_s23 = sshll.u32 %s440_s24, 4  ;;  %s2406_s23 = int_to_ptr.vmem [resolvable:$true] %s447_s23 }
  0x9a   : > { %p2402_p2 = pnand %p1779_p13, %p48_p3  ;;  %s437_s19 = scalar_lea.sflag [#allocation3], %s436_s12 }
  0x9b   : > { %s2014_s4 = scalar_lea.hbm %s2400_s13, 128  ;;  %s2019_s20 = scalar_lea.hbm %s2603_s0, 256 }
  0x9c   : > { %p2015_p5 = scmp.ne.s32.totalorder %s2400_s13, %s2014_s4  ;;  %p2016_p8 = pneg %p2402_p2 }
  0x9d   : > { %p2020_p4 = scmp.lt.u32.totalorder %s2400_s13, %s2603_s0  ;;  %p2021_p1 = scmp.lt.u32.totalorder %s2019_s20, %s2014_s4 }
  0x9e   : > { %p2017_p7 = pnand %p2016_p8, %p2015_p5  ;;  %p2023_p10 = scmp.lt.u32.totalorder %s2014_s4, %s2400_s13 }
  0x9f   : > { %p2022_p3 = por %p2021_p1, %p2020_p4 }
  0xa0   : > { %p2018_p9 = pneg %p2017_p7 }
  0xa1   : > { %p2024_p12 = por %p2023_p10, %p2022_p3 }
  0xa3   : > { %p2025_p13 = pnand %p2024_p12, %p2018_p9 }
  0xa5   : > { %2028 = shalt.err (!%p2025_p13)
}
  0xa6   : > { %s2029_s12 = scalar_lea.vmem %s2406_s23, 128  ;;  %s2131_s1 = smov [#allocation2]  }
  0xa7   : > { %p2030_p5 = scmp.ne.s32.totalorder %s2406_s23, %s2029_s12  ;;  %s2034_s17 = sshll.u32 %s2131_s1, 4  ;;  %s2035_s17 = int_to_ptr.vmem [resolvable:$false] %s2034_s17 }
  0xa8   : > { %s2036_s10 = scalar_lea.vmem %s2035_s17, 256  ;;  %p2037_p6 = scmp.lt.s32.totalorder %s2406_s23, %s2035_s17 }
  0xa9   : > { %p2032_p7 = pnand %p2030_p5, %p2016_p8  ;;  %p2038_p4 = scmp.lt.s32.totalorder %s2036_s10, %s2029_s12 }
  0xab   : > { %p2033_p0 = pneg %p2032_p7  ;;  %p2039_p1 = por %p2038_p4, %p2037_p6 }
  0xad   : > { %p2040_p3 = pnand %p2039_p1, %p2033_p0 }
  0xaf   : > { %2043 = shalt.err (!%p2040_p3)
}
  0xb0   : > { %1769 = dma.hbm_to_vmem [thread:$0]  (!%p2402_p2), %s2400_s13, 128, %s2406_s23, %s437_s19  }
  0xb1   : > { %p2642_p9 = scmp.ne.s32.totalorder %s2630_s15, 0 }
  0xb2   : > { %s2436_s4 = sand.u32 (!%p2642_p9), 1, %s2114_s26  }
  0xb3   : > { %456 = sbr.rel (%p2642_p9) target bundleno = 1841 (0x731), region = 72  ;;  %s1518_s20 = sshll.u32 (!%p2642_p9), %s2436_s4, 3 }
  0xb4   : > { %s459_s24 = scalar_lea.sflag (!%p2642_p9), [#allocation3], %s2436_s4  ;;  %s462_s12 = scalar_lea.vmem (!%p2642_p9), [#allocation2], %s1518_s20 }
  0xba   : > { %2089 = dma.done.wait (%p2382_p11), %s459_s24, 128  }
  0xbb   : > { %2091 = vsyncadd (%p2382_p11), %s459_s24, 4294967168  ;;  %p2643_p6 = scmp.eq.s32.totalorder %s2227_s14, 0 }
  0xbd   : > { %2093 = dma.done.wait (%p2643_p6), [#allocation6], 160   ;;  %p2644_p0 = pmov %p2643_p6 }
  0xbf   : > { %2095 = vsyncadd (%p2644_p0), [#allocation6], 4294967136  ;;  %p2645_p2 = pmov %p2644_p0 }
  0xc0   : > { %p2646_p8 = pmov %p2644_p0 }
  0xc1   : > { %2097 = dma.done.wait (%p2645_p2), [#allocation9], 3072  }
  0xc2   : > { %2099 = vsyncadd (%p2646_p8), [#allocation9], 4294964224  ;;  %p2647_p10 = pmov %p2644_p0 }
  0xc3   : > { %p2648_p12 = pmov %p2644_p0 }
  0xc4   : > { %2101 = dma.done.wait (%p2647_p10), [#allocation12], 1024  }
  0xc5   : > { %2103 = vsyncadd (%p2648_p12), [#allocation12], 4294966272  ;;  %v2132_v0 = vmov 0   ;;  %vm550_vm0 = vcmask 1043456   ;;  %v600_v1 = vld [vmem:[%s2606_s3] sm:$0xff]  ;;  %v528_v3 = vld [vmem:[#allocation5] sm:$0xff]  ;;  %v531_v12 = vlaneseq }
  0xc6   : > { %656 = vmatprep.mubr.bf16.mxu1 %v2132_v0  ;;  %589 = vmatprep.mubr.bf16.mxu0 %v2132_v0  ;;  %v526_v2 = vld [vmem:[%s462_s12] sm:$0xff]  ;;  %v1530_v4 = vcombine.high %v600_v1, %v600_v1  ;;  %v1529_v5 = vcombine.low %v600_v1, %v600_v1  ;;  %v1526_v6 = vcombine.high %v528_v3, %v528_v3  ;;  %vm546_vm1 = vcmask 64512   ;;  %v601_v15 = vld [vmem:[#allocation7] sm:$0x3]  ;;  %s2649_s30 = sld [smem:[#allocation21_spill]]  ;;  %s2650_s18 = sld [smem:[#allocation22_spill]] }
  0xc7   : > { %v1525_v7 = vcombine.low %v528_v3, %v528_v3  ;;  %v527_v9 = vpack.c.bf16 %v526_v2, %v526_v2  ;;  %v2133_v11 = vmov 0.0   ;;  %vm2134_vm2 = vmmov 0   ;;  %v529_v17 = vld [vmem:[%s2605_s2] sm:$0x3]  ;;  %s1575_s19 = sshll.u32 %s2227_s14, 7  ;;  %s524_s1 = scalar_lea.vmem [#allocation13], %s1518_s20 }
  0xc8   : > { %1531 = vmatprep.subr.msk.bf16.mxu1 %vm550_vm0, %v1530_v4  ;;  %v619_v8 = vsel %vm550_vm0, %v1529_v5, 0  ;;  %1527 = vmatprep.subr.msk.bf16.mxu0 %vm550_vm0, %v1526_v6  ;;  %v532_v13 = vshrl.u32 %v531_v12, 7  ;;  %v667_v38 = vld [vmem:[%s2608_s5] sm:$0xff]  ;;  %s1389_s17 = sshll.u32 %s524_s1, 4  ;;  %s2651_s12 = sld [smem:[#allocation23_spill]]  ;;  %s2561_s17 = int_to_ptr.vmem [resolvable:$true] %s1389_s17 }
  0xc9   : > { %625 = vmatpush1.bf16.msra.mxu1 %v619_v8  ;;  %v552_v10 = vsel %vm550_vm0, %v1525_v7, 0  ;;  %v1534_v39 = vcombine.high %v667_v38, %v667_v38  ;;  %v1533_v40 = vcombine.low %v667_v38, %v667_v38  ;;  %v668_v52 = vld [vmem:[%s2609_s6] sm:$0x3]  ;;  %v1838_v8 = vld [vmem:[#allocation8 + $0x48] sm:$0xff]   ;;  %s1376_s14 = scalar_lea.sflag [#allocation4], %s2436_s4  ;;  %p2652_p13 = scmp.ne.s32.totalorder %s2639_s29, 0 }
  0xca   : > { %558 = vmatpush1.bf16.msra.mxu0 %v552_v10  ;;  %1622 = vmatprep.subr.bf16.mxu1 %v2133_v11  ;;  %v533_v14 = vsub.s32 0, %v532_v13  ;;  %v2473_v18 = vsub.s32 1, %v532_v13  ;;  %v1836_v7 = vld [vmem:[#allocation8 + $0x40] sm:$0xff]   ;;  %v1842_v10 = vld [vmem:[#allocation8 + $0x58] sm:$0xff]   ;;  %s2135_s20 = smov [#allocation13]  }
  0xcb   : > { %1535 = vmatprep.subr.msk.bf16.mxu0 %vm550_vm0, %v1534_v39  ;;  %v686_v41 = vsel %vm550_vm0, %v1533_v40, 0  ;;  %v1844_v12 = vld [vmem:[#allocation8 + $0x60] sm:$0xff]   ;;  %s2048_s13 = sshll.u32 %s2135_s20, 4  ;;  %s2049_s13 = int_to_ptr.vmem [resolvable:$false] %s2048_s13 }
  0xcc   : > { %1532 = vmatmul.mubr.msk.bf16.vlgmr.msra.gmra.mrb[0].mxu1 %vm546_vm1, %v527_v9  ;;  %v606_v16 = vrot.slane %v601_v15, %v533_v14  ;;  %v534_v20 = vrot.slane %v529_v17, %v533_v14  ;;  %v610_v27 = vrot.slane %v601_v15, %v2473_v18  ;;  %v538_v34 = vrot.slane %v529_v17, %v2473_v18  ;;  %s2050_s23 = scalar_lea.vmem %s2049_s13, 256  ;;  %p2051_p4 = scmp.lt.s32.totalorder %s2561_s17, %s2049_s13 }
  0xcd   : > { %1528 = vmatmul.mubr.msk.bf16.vlgmr.msra.gmra.mrb[0].mxu0 %vm546_vm1, %v527_v9  ;;  %1624 = vmatprep.mubr.msk.bf16.mxu1 %vm2134_vm2, %v2133_v11  ;;  %v673_v53 = vrot.slane %v668_v52, %v533_v14  ;;  %v677_v14 = vrot.slane %v668_v52, %v2473_v18  ;;  %v1834_v18 = vld [vmem:[#allocation8] sm:$0xff]   ;;  %v1856_v52 = vld [vmem:[#allocation10 + $0x30] sm:$0xff]  }
  0xce   : > { %723 = vmatprep.mubr.bf16.mxu0 %v2132_v0  ;;  %692 = vmatpush1.bf16.msra.mxu0 %v686_v41  ;;  %s2559_s15 = scalar_lea.hbm %s2651_s12, %s1575_s19 }
  0xcf   : > { %1628 = vmatprep.subr.bf16.mxu0 %v2133_v11 }
  0xd5   : > { %1536 = vmatmul.mubr.msk.bf16.vlgmr.msra.gmra.mrb[4].mxu0 %vm546_vm1, %v527_v9  ;;  %v1840_v9 = vld [vmem:[#allocation8 + $0x50] sm:$0xff]  }
  0xd6   : > { %1630 = vmatprep.mubr.msk.bf16.mxu0 %vm2134_vm2, %v2133_v11 }
 0x19f   : > { %v658_v19 = vpop.f32.mrb[0].mxu1 }
 0x1a0   : > { %v659_v21 = vadd.f32 %v658_v19, %v606_v16  ;;  %v660_v22 = vpop.f32.mrb[1].mxu1  ;;  %v591_v23 = vpop.f32.mrb[0].mxu0 }
 0x1a1   : > { %v662_v24 = vpop.f32.mrb[2].mxu1  ;;  %v593_v25 = vpop.f32.mrb[1].mxu0  ;;  %v592_v30 = vadd.f32 %v591_v23, %v534_v20  ;;  %v661_v32 = vadd.f32 %v660_v22, %v610_v27  ;;  %v1837_v27 = vld [vmem:[#allocation8 + $0x10] sm:$0xff]  }
 0x1a2   : > { %v665_v26 = vpack.c.bf16 %v659_v21, %v659_v21  ;;  %v663_v28 = vpop.f32.mrb[3].mxu1  ;;  %v595_v29 = vpop.f32.mrb[2].mxu0  ;;  %v594_v36 = vadd.f32 %v593_v25, %v538_v34  ;;  %v1848_v34 = vld [vmem:[#allocation8 + $0x70] sm:$0xff]  }
 0x1a3   : > { %v596_v31 = vpop.f32.mrb[3].mxu0  ;;  %v598_v33 = vpack.c.bf16 %v592_v30, %v592_v30  ;;  %v666_v35 = vpack.c.bf16 %v661_v32, %v661_v32  ;;  %v1839_v28 = vld [vmem:[#allocation8 + $0x18] sm:$0xff]   ;;  %v1841_v29 = vld [vmem:[#allocation8 + $0x20] sm:$0xff]   ;;  %v1843_v30 = vld [vmem:[#allocation8 + $0x28] sm:$0xff]  }
 0x1a4   : > { %1623 = vmatpush3.bf16.xpose.msra.mxu1 %v665_v26  ;;  %v599_v37 = vpack.c.bf16 %v594_v36, %v594_v36  ;;  %v1835_v26 = vld [vmem:[#allocation8 + $0x8] sm:$0xff]   ;;  %v1845_v31 = vld [vmem:[#allocation8 + $0x30] sm:$0xff]  }
 0x1a5   : > { %1634 = vmatprep.subr.bf16.mxu1 %v2133_v11  ;;  %v1846_v32 = vld [vmem:[#allocation8 + $0x68] sm:$0xff]  }
 0x1a8   : > { %v725_v54 = vpop.f32.mrb[4].mxu0 }
 0x1a9   : > { %v726_v55 = vadd.f32 %v725_v54, %v673_v53  ;;  %v727_v4 = vpop.f32.mrb[5].mxu0  ;;  %v1857_v53 = vld [vmem:[#allocation10 + $0x38] sm:$0xff]   ;;  %v1858_v54 = vld [vmem:[#allocation11] sm:$0xff]  }
 0x1aa   : > { %v729_v5 = vpop.f32.mrb[6].mxu0  ;;  %v728_v15 = vadd.f32 %v727_v4, %v677_v14 }
 0x1ab   : > { %1625 = vmatmul.mubr.bf16.vlgmr.msra.gmra.mrb[4].mxu1 %v598_v33  ;;  %v732_v56 = vpack.c.bf16 %v726_v55, %v726_v55  ;;  %v730_v6 = vpop.f32.mrb[7].mxu0  ;;  %v1847_v33 = vld [vmem:[#allocation8 + $0x38] sm:$0xff]   ;;  %v1859_v55 = vld [vmem:[#allocation11 + $0x8] sm:$0xff]  }
 0x1ac   : > { %1635 = vmatpush3.bf16.xpose.msra.mxu1 %v666_v35  ;;  %1636 = vmatprep.mubr.msk.bf16.mxu1 %vm2134_vm2, %v2133_v11  ;;  %v733_v20 = vpack.c.bf16 %v728_v15, %v728_v15  ;;  %v1849_v35 = vld [vmem:[#allocation8 + $0x78] sm:$0xff]  }
 0x1ad   : > { %1646 = vmatprep.subr.bf16.mxu1 %v2133_v11  ;;  %v790_v57 = vsel %vm550_vm0, %v732_v56, 0  ;;  %v1860_v56 = vld [vmem:[#allocation11 + $0x10] sm:$0xff]  }
 0x1ae   : > { %1629 = vmatpush3.bf16.msra.mxu0 %v790_v57  ;;  %v905_v22 = vsel %vm550_vm0, %v733_v20, 0  ;;  %v1861_v57 = vld [vmem:[#allocation11 + $0x18] sm:$0xff]  }
 0x1af   : > { %1640 = vmatprep.subr.bf16.mxu0 %v2133_v11 }
 0x1b3   : > { %1637 = vmatmul.mubr.bf16.vlgmr.msra.gmra.mrb[8].mxu1 %v599_v37 }
 0x1b4   : > { %1662 = vmatprep.mubr.msk.bf16.mxu1 %vm2134_vm2, %v2133_v11  ;;  %1647 = vmatpush3.bf16.msra.mxu1 %v1836_v7 }
 0x1b5   : > { %1648 = vmatprep.subr.bf16.mxu1 %v2133_v11 }
 0x1b8   : > { %1649 = vmatpush3.bf16.msra.mxu1 %v1838_v8  ;;  %v1864_v8 = vld [vmem:[#allocation11 + $0x30] sm:$0xff]  }
 0x1b9   : > { %1650 = vmatprep.subr.bf16.mxu1 %v2133_v11 }
 0x1bc   : > { %1651 = vmatpush3.bf16.msra.mxu1 %v1840_v9  ;;  %v1865_v9 = vld [vmem:[#allocation11 + $0x38] sm:$0xff]  }
 0x1bd   : > { %1652 = vmatprep.subr.bf16.mxu1 %v2133_v11 }
 0x1c0   : > { %1653 = vmatpush3.bf16.msra.mxu1 %v1842_v10  ;;  %v1556_v10 = vld [vmem:[%s2649_s30] ss:$0 sm:$0xff]  ;;  %s2044_s30 = scalar_lea.vmem %s2561_s17, 128 }
 0x1c1   : > { %1654 = vmatprep.subr.bf16.mxu1 %v2133_v11  ;;  %p2045_p11 = scmp.ne.s32.totalorder %s2561_s17, %s2044_s30  ;;  %p2052_p1 = scmp.lt.s32.totalorder %s2050_s23, %s2044_s30 }
 0x1c3   : > { %p2046_p5 = pnand %p2045_p11, %p2652_p13  ;;  %p2053_p3 = por %p2052_p1, %p2051_p4 }
 0x1c4   : > { %1655 = vmatpush3.bf16.msra.mxu1 %v1844_v12 }
 0x1c5   : > { %1656 = vmatprep.subr.bf16.mxu1 %v2133_v11  ;;  %p2047_p7 = pneg %p2046_p5 }
 0x1c7   : > { %p2054_p9 = pnand %p2053_p3, %p2047_p7 }
 0x1c8   : > { %1657 = vmatpush3.bf16.msra.mxu1 %v1846_v32 }
 0x1c9   : > { %1658 = vmatprep.subr.bf16.mxu1 %v2133_v11 }
 0x1cc   : > { %1659 = vmatpush3.bf16.msra.mxu1 %v1848_v34 }
 0x1cd   : > { %1660 = vmatprep.subr.bf16.mxu1 %v2133_v11 }
 0x1d0   : > { %1661 = vmatpush3.bf16.msra.mxu1 %v1849_v35 }
 0x1d1   : > { %1686 = vmatprep.subr.bf16.mxu1 %v2133_v11 }
 0x27e   : > { %v768_v42 = vpop.f32.mrb[4].mxu1 }
 0x27f   : > { %v1626_v43 = vpop.f32.mrb[5].mxu1  ;;  %v774_v44 = vsel %vm546_vm1, %v768_v42, -inf }
 0x280   : > { %775 = vmax.xlane.f32.xlu0 %v774_v44  ;;  %v771_v45 = vpop.f32.mrb[6].mxu1 }
 0x281   : > { %v1627_v46 = vpop.f32.mrb[7].mxu1 }
 0x286   : > { %v883_v47 = vpop.f32.mrb[8].mxu1 }
 0x287   : > { %v1638_v48 = vpop.f32.mrb[9].mxu1  ;;  %v889_v49 = vsel %vm546_vm1, %v883_v47, -inf }
 0x288   : > { %890 = vmax.xlane.f32.xlu0 %v889_v49  ;;  %v886_v50 = vpop.f32.mrb[10].mxu1  ;;  %v1852_v48 = vld [vmem:[#allocation10 + $0x10] sm:$0xff]   ;;  %v1853_v49 = vld [vmem:[#allocation10 + $0x18] sm:$0xff]  }
 0x289   : > { %v1639_v51 = vpop.f32.mrb[11].mxu1  ;;  %v1854_v50 = vld [vmem:[#allocation10 + $0x20] sm:$0xff]  }
 0x28a   : > { %v1855_v51 = vld [vmem:[#allocation10 + $0x28] sm:$0xff]  }
 0x30d   : > { %v776_v58 = vpop.xlane.xlu0 %775 }
 0x30e   : > { %v777_v59 = vsub.f32 %v768_v42, %v776_v58  ;;  %v1850_v42 = vld [vmem:[#allocation10] sm:$0xff]  }
 0x30f   : > { %v1862_v58 = vld [vmem:[#allocation11 + $0x20] sm:$0xff]  }
 0x310   : > { %v778_v60 = vmul.f32 1.442695, %v777_v59  ;;  %v1863_v59 = vld [vmem:[#allocation11 + $0x28] sm:$0xff]  }
 0x312   : > { %1866 = vpow2.f32 %v778_v60 }
 0x315   : > { %v891_v61 = vpop.xlane.xlu0 %890 }
 0x316   : > { %v892_v62 = vsub.f32 %v883_v47, %v891_v61  ;;  %v1851_v47 = vld [vmem:[#allocation10 + $0x8] sm:$0xff]  }
 0x318   : > { %v893_v63 = vmul.f32 1.442695, %v892_v62 }
 0x31a   : > { %1868 = vpow2.f32 %v893_v63 }
 0x31c   : > { %v1867_v0 = vpop.eup %1866 }
 0x31d   : > { %v780_v1 = vsel %vm546_vm1, %v1867_v0, 0.0 }
 0x31e   : > { %781 = vadd.xlane.f32.xlu1 %v780_v1  ;;  %v1555_v1 = vld [vmem:[%s2611_s8] ss:$0 sm:$0xff] }
 0x324   : > { %v1869_v2 = vpop.eup %1868 }
 0x325   : > { %v895_v3 = vsel %vm546_vm1, %v1869_v2, 0.0 }
 0x326   : > { %896 = vadd.xlane.f32.xlu1 %v895_v3 }
 0x3ab   : > { %v782_v13 = vpop.xlane.xlu1 %781 }
 0x3ac   : > { %1870 = vrcp.f32 %v782_v13 }
 0x3b3   : > { %v897_v16 = vpop.xlane.xlu1 %896 }
 0x3b4   : > { %1872 = vrcp.f32 %v897_v16 }
 0x3b6   : > { %v1871_v17 = vpop.eup %1870 }
 0x3b7   : > { %v784_v19 = vmul.f32 %v1871_v17, %v1867_v0 }
 0x3b9   : > { %v785_v21 = vpack.c.bf16 %v784_v19, %v784_v19 }
 0x3bb   : > { %1631 = vmatmul.mubr.msk.bf16.vlgmr.msra.gmra.mrb[8].mxu0 %vm546_vm1, %v785_v21 }
 0x3bc   : > { %1641 = vmatpush3.bf16.msra.mxu0 %v905_v22  ;;  %1642 = vmatprep.mubr.msk.bf16.mxu0 %vm2134_vm2, %v2133_v11 }
 0x3bd   : > { %1666 = vmatprep.subr.bf16.mxu0 %v2133_v11 }
 0x3be   : > { %v1873_v23 = vpop.eup %1872 }
 0x3bf   : > { %v899_v24 = vmul.f32 %v1873_v23, %v1869_v2 }
 0x3c1   : > { %v900_v25 = vpack.c.bf16 %v899_v24, %v899_v24 }
 0x3c3   : > { %1643 = vmatmul.mubr.msk.bf16.vlgmr.msra.gmra.mrb[12].mxu0 %vm546_vm1, %v900_v25 }
 0x3c4   : > { %1667 = vmatpush3.bf16.msra.mxu0 %v1834_v18  ;;  %1682 = vmatprep.mubr.msk.bf16.mxu0 %vm2134_vm2, %v2133_v11 }
 0x3c5   : > { %1668 = vmatprep.subr.bf16.mxu0 %v2133_v11 }
 0x3c8   : > { %1669 = vmatpush3.bf16.msra.mxu0 %v1835_v26 }
 0x3c9   : > { %1670 = vmatprep.subr.bf16.mxu0 %v2133_v11 }
 0x3cc   : > { %1671 = vmatpush3.bf16.msra.mxu0 %v1837_v27 }
 0x3cd   : > { %1672 = vmatprep.subr.bf16.mxu0 %v2133_v11 }
 0x3d0   : > { %1673 = vmatpush3.bf16.msra.mxu0 %v1839_v28 }
 0x3d1   : > { %1674 = vmatprep.subr.bf16.mxu0 %v2133_v11 }
 0x3d4   : > { %1675 = vmatpush3.bf16.msra.mxu0 %v1841_v29 }
 0x3d5   : > { %1676 = vmatprep.subr.bf16.mxu0 %v2133_v11 }
 0x3d8   : > { %1677 = vmatpush3.bf16.msra.mxu0 %v1843_v30 }
 0x3d9   : > { %1678 = vmatprep.subr.bf16.mxu0 %v2133_v11 }
 0x3dc   : > { %1679 = vmatpush3.bf16.msra.mxu0 %v1845_v31 }
 0x3dd   : > { %1680 = vmatprep.subr.bf16.mxu0 %v2133_v11 }
 0x3e0   : > { %1681 = vmatpush3.bf16.msra.mxu0 %v1847_v33 }
 0x3e1   : > { %1706 = vmatprep.subr.bf16.mxu0 %v2133_v11 }
 0x48e   : > { %v826_v36 = vpop.f32.mrb[8].mxu0 }
 0x48f   : > { %v832_v37 = vpack.c.bf16 %v826_v36, %v826_v36  ;;  %v1632_v38 = vpop.f32.mrb[9].mxu0 }
 0x490   : > { %v829_v39 = vpop.f32.mrb[10].mxu0 }
 0x491   : > { %v1633_v40 = vpop.f32.mrb[11].mxu0  ;;  %1683 = vmatmul.mubr.bf16.vlgmr.msra.gmra.mrb[16].mxu0 %v832_v37 }
 0x492   : > { %1722 = vmatprep.mubr.msk.bf16.mxu0 %vm2134_vm2, %v2133_v11  ;;  %1707 = vmatpush3.bf16.msra.mxu0 %v1858_v54 }
 0x493   : > { %1708 = vmatprep.subr.bf16.mxu0 %v2133_v11 }
 0x496   : > { %v941_v41 = vpop.f32.mrb[12].mxu0  ;;  %1709 = vmatpush3.bf16.msra.mxu0 %v1859_v55 }
 0x497   : > { %v947_v43 = vpack.c.bf16 %v941_v41, %v941_v41  ;;  %v1644_v44 = vpop.f32.mrb[13].mxu0  ;;  %1710 = vmatprep.subr.bf16.mxu0 %v2133_v11 }
 0x498   : > { %v944_v45 = vpop.f32.mrb[14].mxu0 }
 0x499   : > { %v1645_v46 = vpop.f32.mrb[15].mxu0  ;;  %1663 = vmatmul.mubr.bf16.vlgmr.msra.gmra.mrb[12].mxu1 %v947_v43 }
 0x49a   : > { %1687 = vmatpush3.bf16.msra.mxu1 %v1850_v42  ;;  %1702 = vmatprep.mubr.msk.bf16.mxu1 %vm2134_vm2, %v2133_v11 }
 0x49b   : > { %1688 = vmatprep.subr.bf16.mxu1 %v2133_v11  ;;  %1711 = vmatpush3.bf16.msra.mxu0 %v1860_v56 }
 0x49c   : > { %1712 = vmatprep.subr.bf16.mxu0 %v2133_v11 }
 0x49e   : > { %1689 = vmatpush3.bf16.msra.mxu1 %v1851_v47 }
 0x49f   : > { %1690 = vmatprep.subr.bf16.mxu1 %v2133_v11  ;;  %1713 = vmatpush3.bf16.msra.mxu0 %v1861_v57 }
 0x4a0   : > { %1714 = vmatprep.subr.bf16.mxu0 %v2133_v11 }
 0x4a2   : > { %1691 = vmatpush3.bf16.msra.mxu1 %v1852_v48 }
 0x4a3   : > { %1692 = vmatprep.subr.bf16.mxu1 %v2133_v11  ;;  %1715 = vmatpush3.bf16.msra.mxu0 %v1862_v58 }
 0x4a4   : > { %1716 = vmatprep.subr.bf16.mxu0 %v2133_v11 }
 0x4a6   : > { %1693 = vmatpush3.bf16.msra.mxu1 %v1853_v49 }
 0x4a7   : > { %1694 = vmatprep.subr.bf16.mxu1 %v2133_v11  ;;  %1717 = vmatpush3.bf16.msra.mxu0 %v1863_v59 }
 0x4a8   : > { %1718 = vmatprep.subr.bf16.mxu0 %v2133_v11 }
 0x4aa   : > { %1695 = vmatpush3.bf16.msra.mxu1 %v1854_v50 }
 0x4ab   : > { %1696 = vmatprep.subr.bf16.mxu1 %v2133_v11  ;;  %1719 = vmatpush3.bf16.msra.mxu0 %v1864_v8 }
 0x4ac   : > { %1720 = vmatprep.subr.bf16.mxu0 %v2133_v11 }
 0x4ae   : > { %1697 = vmatpush3.bf16.msra.mxu1 %v1855_v51 }
 0x4af   : > { %1698 = vmatprep.subr.bf16.mxu1 %v2133_v11  ;;  %1721 = vmatpush3.bf16.msra.mxu0 %v1865_v9 }
 0x4b2   : > { %1699 = vmatpush3.bf16.msra.mxu1 %v1856_v52 }
 0x4b3   : > { %1700 = vmatprep.subr.bf16.mxu1 %v2133_v11  ;;  %v1565_v11 = vld [vmem:[%s2650_s18] ss:$0 sm:$0xff] }
 0x4b6   : > { %1701 = vmatpush3.bf16.msra.mxu1 %v1857_v53 }
 0x564   : > { %v1135_v60 = vpop.f32.mrb[16].mxu0 }
 0x565   : > { %v1684_v61 = vpop.f32.mrb[17].mxu0 }
 0x566   : > { %v1138_v62 = vpop.f32.mrb[18].mxu0 }
 0x567   : > { %v1685_v63 = vpop.f32.mrb[19].mxu0 }
 0x56c   : > { %v1047_v0 = vpop.f32.mrb[12].mxu1 }
 0x56d   : > { %v1136_v2 = vadd.f32 %v1135_v60, %v1047_v0  ;;  %v1664_v3 = vpop.f32.mrb[13].mxu1 }
 0x56e   : > { %v1050_v4 = vpop.f32.mrb[14].mxu1 }
 0x56f   : > { %v1148_v5 = vadd.f32 %v1555_v1, %v1136_v2  ;;  %v1665_v6 = vpop.f32.mrb[15].mxu1 }
 0x571   : > { %v1149_v7 = vpack.c.bf16 %v1148_v5, %v1148_v5 }
 0x573   : > { %1703 = vmatmul.mubr.bf16.vlgmr.msra.gmra.mrb[16].mxu1 %v1149_v7 }
 0x646   : > { %v1255_v12 = vpop.f32.mrb[16].mxu1 }
 0x647   : > { %v1256_v13 = vadd.f32 %v1556_v10, %v1255_v12  ;;  %v1704_v14 = vpop.f32.mrb[17].mxu1 }
 0x648   : > { %v1258_v15 = vpop.f32.mrb[18].mxu1 }
 0x649   : > { %v1261_v16 = vmax.f32 %v1256_v13, 0.0  ;;  %v1705_v17 = vpop.f32.mrb[19].mxu1 }
 0x64b   : > { %v1262_v19 = vpack.c.bf16 %v1261_v16, %v1261_v16 }
 0x64d   : > { %1723 = vmatmul.mubr.bf16.vlgmr.msra.gmra.mrb[20].mxu0 %v1262_v19 }
 0x720   : > { %v1368_v20 = vpop.f32.mrb[20].mxu0 }
 0x721   : > { %v1369_v21 = vadd.f32 %v1565_v11, %v1368_v20  ;;  %v1724_v22 = vpop.f32.mrb[21].mxu0 }
 0x722   : > { %v1371_v23 = vpop.f32.mrb[22].mxu0 }
 0x723   : > { %1374 = vst [vmem:[%s524_s1] sm:$0xff] %v1369_v21  ;;  %v1725_v24 = vpop.f32.mrb[23].mxu0 }
 0x724   : > { %2057 = shalt.err (!%p2054_p9)
}
 0x725   : > { %s2058_s4 = scalar_lea.hbm %s2559_s15, 128  ;;  %s2062_s1 = scalar_lea.hbm %s2651_s12, 256 }
 0x726   : > { %p2059_p6 = scmp.ne.s32.totalorder %s2559_s15, %s2058_s4  ;;  %p2063_p8 = scmp.lt.u32.totalorder %s2559_s15, %s2651_s12 }
 0x727   : > { %p2064_p10 = scmp.lt.u32.totalorder %s2062_s1, %s2058_s4  ;;  %p2066_p11 = scmp.lt.u32.totalorder %s2058_s4, %s2559_s15 }
 0x728   : > { %p2060_p0 = pnand %p2059_p6, %p2652_p13 }
 0x729   : > { %p2065_p12 = por %p2064_p10, %p2063_p8 }
 0x72a   : > { %p2061_p2 = pneg %p2060_p0 }
 0x72b   : > { %p2067_p5 = por %p2066_p11, %p2065_p12 }
 0x72d   : > { %p2068_p7 = pnand %p2067_p5, %p2061_p2 }
 0x72f   : > { %2071 = shalt.err (!%p2068_p7)
}
 0x730   : > { %1748 = dma.vmem_to_hbm [thread:$0]  (%p2652_p13), %s2561_s17, 128, %s2559_s15, %s1376_s14  }
 0x731 PF: > { %s1401_s30 = sand.u32 1, %s2110_s25   ;;  %p2653_p4 = scmp.ne.s32.totalorder %s2640_s22, 0 }
 0x732   : > { %p2654_p1 = scmp.ge.s32.totalorder %s2122_s28, 2  ;;  %s1402_s20 = scalar_lea.sflag [#allocation4], %s1401_s30 }
 0x734   : > { %p1771_p3 = pnand %p2654_p1, %p2653_p4 }
 0x736   : > { %2105 = dma.done.wait (!%p1771_p3), %s1402_s20, 128  }
 0x737   : > { %2107 = vsyncadd (!%p1771_p3), %s1402_s20, 4294967168  ;;  %p29_p9 = scmp.ge.s32.totalorder %s2366_s16, 4   ;;  %s2655_s25 = smov %s2114_s26 }
 0x738   : > { %s2656_s26 = smov %s2118_s27  ;;  %s2657_s27 = smov %s2378_s21 }
 0x739   : > { %s2658_s28 = smov %s2366_s16  ;;  %31 = sbr.rel (!%p29_p9) target bundleno = 14 (0xe), region = 138 }
 0x740   :  { %1407 = vsyncpa [#allocation3], 1 }
 0x741   :  { %1409 = vsyncpa [#allocation3 + $0x1], 1 }
 0x742   :  { %1410 = vsyncpa [#allocation6], 1 }
 0x743   :  { %1411 = vsyncpa [#allocation9], 1 }
 0x744   :  { %1412 = vsyncpa [#allocation12], 1 }
 0x745   :  { %1413 = vsyncpa [#allocation4], 1 }
 0x746   :  { %1415 = vsyncpa [#allocation4 + $0x1], 1 }

</bundles_post_ra>
